<compile_context>
chip_gen: v6e
topology: v6e:2x2x1
jax: 0.10.0
libtpu: 0.0.40
codegen_flags: <defaults>
</compile_context>

<pallas_src>
import jax
import jax.numpy as jnp
from jax.experimental import pallas as pl
from jax.experimental.pallas import tpu as pltpu


def _net1_kernel(x_ref, w_ref, b_ref, o_ref):
    # x_ref: (TB, F) f32 VMEM tile
    # w_ref: (1, F)  f32 VMEM (resident across grid steps)
    # b_ref: (1, 1)  f32 SMEM scalar
    # o_ref: (TB, 1) f32 VMEM tile
    y = jnp.sum(x_ref[...] * w_ref[...], axis=-1, keepdims=True) + b_ref[0, 0]
    # sigmoid: exp on EUP, approx reciprocal also on EUP (keeps VALU free)
    o_ref[...] = pl.reciprocal(1.0 + jnp.exp(-y), approx=True)


def net1_forward(x, w, b, *, block_b=512):
    """Net1 forward: sigmoid(x @ w.T + b).

    x: (B, F) f32, w: (1, F) f32 (PyTorch Linear layout), b: (1, 1) f32
    returns (B, 1) f32.
    """
    B, F = x.shape
    assert w.shape == (1, F)
    assert b.shape == (1, 1)

    # Batch tile: biggest that comfortably fits scoped VMEM (2 buffers * TB*F*4B).
    # Must be a multiple of 8 (sublane) unless it equals the full batch dim.
    tb = min(block_b, B)
    if tb != B and tb % 8 != 0:
        tb = max(8, (tb // 8) * 8)
    grid = (pl.cdiv(B, tb),)  # tail block (if any) relies on Pallas partial-block masking

    return pl.pallas_call(
        _net1_kernel,
        out_shape=jax.ShapeDtypeStruct((B, 1), jnp.float32),
        grid=grid,
        in_specs=[
            pl.BlockSpec((tb, F), lambda i: (i, 0)),               # batch tile of x
            pl.BlockSpec((1, F), lambda i: (0, 0)),                # resident weight
            pl.BlockSpec(memory_space=pltpu.MemorySpace.SMEM),     # bias scalar in SMEM
        ],
        out_specs=pl.BlockSpec((tb, 1), lambda i: (i, 0)),
        compiler_params=pltpu.CompilerParams(
            dimension_semantics=("parallel",),      # shard batch tiles across TCs (v7x)
            vmem_limit_bytes=64 * 1024 * 1024,      # let v5e (16 MiB default) take big tiles
        ),
    )(x, w, b)


def init_net1_params(key, nb_features):
    # Mimics torch.nn.Linear default init: U(-1/sqrt(F), 1/sqrt(F)).
    # Weight stored lane-dense as (1, F), matching PyTorch's (out, in) layout.
    kw, kb = jax.random.split(key)
    bound = 1.0 / jnp.sqrt(jnp.float32(nb_features))
    w = jax.random.uniform(kw, (1, nb_features), jnp.float32, -bound, bound)
    b = jax.random.uniform(kb, (1, 1), jnp.float32, -bound, bound)
    return w, b


if __name__ == "__main__":
    key = jax.random.PRNGKey(0)
    k_x, k_p = jax.random.split(key)

    batch, nb_features = 64, 128        # small, lane-dense F; exercises a 4-step grid
    x = jax.random.normal(k_x, (batch, nb_features), jnp.float32)
    w, b = init_net1_params(k_p, nb_features)

    out = net1_forward(x, w, b, block_b=16)   # tb=16 -> grid=(4,)
    out = jax.block_until_ready(out)

    # Reference check in plain JAX (approx reciprocal -> slightly looser tolerance)
    ref = jax.nn.sigmoid(x @ w.T + b)
    assert out.shape == (batch, 1)
    assert jnp.allclose(out, ref, atol=2e-3), "mismatch vs reference"

    print("KERNEL_OK")
</pallas_src>

<mosaic_0001>
module attributes {stable_mosaic.version = 11 : i64} {
  func.func @_net1_kernel(%arg0: i32, %arg1: memref<16x128xf32, #tpu.memory_space<vmem>>, %arg2: memref<1x128xf32, #tpu.memory_space<vmem>>, %arg3: memref<1x1xf32, #tpu.memory_space<smem>>, %arg4: memref<16x1xf32, #tpu.memory_space<vmem>>) attributes {dimension_semantics = [#tpu.dimension_semantics<parallel>], iteration_bounds = array<i64: 4>, scalar_prefetch = 0 : i64, scratch_operands = 0 : i64, tpu.core_type = #tpu.core_type<tc>, window_params = [{transform_indices = @transform_0, window_bounds = array<i64: 16, 128>}, {pipeline_mode = #tpu.pipeline_mode<synchronous>, transform_indices = @transform_1, window_bounds = array<i64: 1, 128>}, {transform_indices = @transform_2, window_bounds = array<i64: 1, 1>}, {transform_indices = @transform_3, window_bounds = array<i64: 16, 1>}]} {
    %c0 = arith.constant 0 : index
    %c0_0 = arith.constant 0 : index
    %0 = vector.load %arg1[%c0, %c0_0] : memref<16x128xf32, #tpu.memory_space<vmem>>, vector<16x128xf32>
    %c0_1 = arith.constant 0 : index
    %c0_2 = arith.constant 0 : index
    %1 = vector.load %arg2[%c0_1, %c0_2] : memref<1x128xf32, #tpu.memory_space<vmem>>, vector<1x128xf32>
    %2 = vector.broadcast %1 : vector<1x128xf32> to vector<16x128xf32>
    %3 = arith.mulf %0, %2 : vector<16x128xf32>
    %cst = arith.constant dense<0.000000e+00> : vector<16xf32>
    %4 = vector.multi_reduction <add>, %3, %cst [1] : vector<16x128xf32> to vector<16xf32>
    %5 = vector.shape_cast %4 : vector<16xf32> to vector<16x1xf32>
    %c0_3 = arith.constant 0 : index
    %c0_4 = arith.constant 0 : index
    %6 = memref.load %arg3[%c0_3, %c0_4] : memref<1x1xf32, #tpu.memory_space<smem>>
    %7 = vector.broadcast %6 : f32 to vector<16x1xf32>
    %8 = arith.addf %5, %7 : vector<16x1xf32>
    %cst_5 = arith.constant 0.000000e+00 : f32
    %9 = vector.broadcast %cst_5 : f32 to vector<16x1xf32>
    %10 = arith.subf %9, %8 : vector<16x1xf32>
    %11 = math.exp %10 : vector<16x1xf32>
    %cst_6 = arith.constant 1.000000e+00 : f32
    %12 = vector.broadcast %cst_6 : f32 to vector<16x1xf32>
    %13 = arith.addf %12, %11 : vector<16x1xf32>
    %14 = tpu.reciprocal %13 {approx = true} : vector<16x1xf32> -> vector<16x1xf32>
    %c0_7 = arith.constant 0 : index
    %c0_8 = arith.constant 0 : index
    %15 = vector.load %arg4[%c0_7, %c0_8] : memref<16x1xf32, #tpu.memory_space<vmem>>, vector<16x1xf32>
    tpu.vector_store %arg4[%c0_7, %c0_8], %14 {strides = array<i32>} : memref<16x1xf32, #tpu.memory_space<vmem>>, vector<16x1xf32>,
    return
  }
  func.func @transform_0(%arg0: i32) -> (i32, i32) {
    %c0_i32 = arith.constant 0 : i32
    %c0_i32_0 = arith.constant 0 : i32
    return %arg0, %c0_i32 : i32, i32
  }
  func.func @transform_1(%arg0: i32) -> (i32, i32) {
    %c0_i32 = arith.constant 0 : i32
    %c0_i32_0 = arith.constant 0 : i32
    %c0_i32_1 = arith.constant 0 : i32
    return %c0_i32, %c0_i32_0 : i32, i32
  }
  func.func @transform_2(%arg0: i32) -> (i32, i32) {
    %c0_i32 = arith.constant 0 : i32
    %c0_i32_0 = arith.constant 0 : i32
    %c0_i32_1 = arith.constant 0 : i32
    return %c0_i32, %c0_i32_0 : i32, i32
  }
  func.func @transform_3(%arg0: i32) -> (i32, i32) {
    %c0_i32 = arith.constant 0 : i32
    %c0_i32_0 = arith.constant 0 : i32
    return %arg0, %c0_i32 : i32, i32
  }
}

</mosaic_0001>

<bundles_post_ra>
// kernel: tpu_custom_call.1
= control target key start
LH: loop header
LB: loop body
LE: loop exit
PB: predicated region body
PF: predicated region fallthrough
CT: control target
= control target key end

     0   :  { %s550_s0 = inlined_call_operand.hbm [shape: f32[64,128], index: 0, kind: input, shape index: {}]   ;;  %s551_s1 = inlined_call_operand.vmem [shape: f32[1,128], index: 1, kind: input, shape index: {}]   ;;  %s552_s2 = inlined_call_operand.<no memory space> [shape: f32[1,1], index: 2, kind: input, shape index: {}]   ;;  %s553_s3 = inlined_call_operand.vmem [shape: f32[64,1], index: 3, kind: output, shape index: {}]  }
   0x1   :  { %8 = sst [smem:[#allocation2]] %s552_s2 }
   0x2   :  { %9 = vsyncpa [#allocation4], 0 }
   0x3   :  { %11 = vsyncpa [#allocation4 + $0x1], 0  ;;  %s447_s14 = smov 0   ;;  %s449_s15 = smov 0  }
   0x4   :  { %s451_s16 = smov 0   ;;  %s453_s17 = smov 0  }
   0x5 LB: > { %s293_s2 = sadd.s32 4294967295, %s419_s17   ;;  %s467_s18 = sadd.s32 1, %s419_s17   ;;  %s419_s17 = sphi %s453_s17, %s562_s17   ;;  %s415_s16 = sphi %s451_s16, %s561_s16   ;;  %s411_s15 = sphi %s449_s15, %s560_s15   ;;  %s407_s14 = sphi %s447_s14, %s559_s14  }
   0x6   : > { %s21_s19 = ssub.s32 %s419_s17, %s467_s18  ;;  %s24_s20 = sadd.s32 1, %s415_s16 }
   0x7   : > { %p22_p0 = scmp.eq.s32.totalorder %s21_s19, 0  ;;  %p31_p1 = scmp.ne.s32.totalorder %s415_s16, %s411_s15 }
   0x8   : > { %p32_p2 = scmp.eq.s32.totalorder %s419_s17, 0  ;;  %p37_p3 = scmp.ne.s32.totalorder %s411_s15, %s407_s14 }
   0x9   : > { %s477_s21 = scalar_select %p22_p0, %s415_s16, %s24_s20  }
   0xa   : > { %p33_p4 = por %p32_p2, %p31_p1  ;;  %p38_p5 = scmp.eq.s32.totalorder %s293_s2, 0 }
   0xb   : > { %p314_p6 = scmp.lt.s32.totalorder %s419_s17, 4  ;;  %s135_s23 = sand.u32 1, %s415_s16  }
   0xc   : > { %p482_p7 = por %p38_p5, %p37_p3  ;;  %s297_s24 = sshll.u32 %s135_s23, 4 }
   0xd   : > { %s307_s25 = sshll.u32 %s419_s17, 8  ;;  %s139_s29 = scalar_lea.vmem [#allocation3], %s297_s24 }
   0xe   : > { %s555_s22 = scalar_select %p482_p7, 1, 0 }
   0xf   : > { %s491_s28 = scalar_lea.hbm %s550_s0, %s307_s25  ;;  %s146_s30 = sshll.u32 %s139_s29, 4  ;;  %s493_s30 = int_to_ptr.vmem [resolvable:$true] %s146_s30 }
  0x10   : > { %p495_p8 = pnand %p314_p6, %p33_p4  ;;  %s500_s5 = scalar_lea.sflag [#allocation4], %s135_s23 }
  0x11   : > { %s357_s6 = scalar_lea.hbm %s491_s28, 256  ;;  %s362_s9 = scalar_lea.hbm %s550_s0, 1024 }
  0x12   : > { %p358_p10 = scmp.ne.s32.totalorder %s491_s28, %s357_s6  ;;  %p359_p11 = pneg %p495_p8 }
  0x13   : > { %p363_p0 = scmp.lt.s32.totalorder %s491_s28, %s550_s0  ;;  %p364_p1 = scmp.lt.s32.totalorder %s362_s9, %s357_s6 }
  0x14   : > { %p360_p12 = pnand %p359_p11, %p358_p10 }
  0x15   : > { %p365_p2 = por %p364_p1, %p363_p0 }
  0x16   : > { %p361_p13 = pneg %p360_p12 }
  0x18   : > { %p366_p3 = pnand %p365_p2, %p361_p13 }
  0x1a   : > { %369 = shalt.err (!%p366_p3)
}
  0x1b   : > { %s370_s12 = scalar_lea.vmem %s493_s30, 256  ;;  %s421_s13 = smov [#allocation3]  }
  0x1c   : > { %p371_p4 = scmp.ne.s32.totalorder %s493_s30, %s370_s12  ;;  %s375_s14 = sshll.u32 %s421_s13, 4  ;;  %s376_s14 = int_to_ptr.vmem [resolvable:$false] %s375_s14 }
  0x1d   : > { %s377_s19 = scalar_lea.vmem %s376_s14, 512  ;;  %p378_p10 = scmp.lt.s32.totalorder %s493_s30, %s376_s14 }
  0x1e   : > { %p373_p5 = pnand %p371_p4, %p359_p11  ;;  %p379_p12 = scmp.lt.s32.totalorder %s377_s19, %s370_s12 }
  0x20   : > { %p374_p6 = pneg %p373_p5  ;;  %p380_p9 = por %p379_p12, %p378_p10 }
  0x22   : > { %p381_p7 = pnand %p380_p9, %p374_p6 }
  0x24   : > { %384 = shalt.err (!%p381_p7)
}
  0x25   : > { %s422_s20 = smov 128   ;;  %s423_s23 = smov 8  }
  0x26   : > { %313 = dma.hbm_to_vmem [thread:$0]  (!%p495_p8), %s491_s28, 256, %s493_s30, %s500_s5, %s422_s20, %s422_s20, %s423_s23  }
  0x27   : > { %p154_p11 = scmp.lt.s32.totalorder %s419_s17, 5  ;;  %p557_p13 = scmp.ge.s32.totalorder %s419_s17, 1 }
  0x29   : > { %p155_p0 = pnand %p557_p13, %p154_p11 }
  0x2a   : > { %s160_s24 = sand.u32 (!%p155_p0), 1, %s411_s15   ;;  %p558_p7 = scmp.ne.s32.totalorder (!%p155_p0), %s555_s22, 0 }
  0x2b   : > { %158 = sbr.rel (%p155_p0) target bundleno = 232 (0xe8), region = 32  ;;  %s301_s25 = sshll.u32 (!%p155_p0), %s160_s24, 4 }
  0x2c   : > { %s161_s26 = scalar_lea.sflag (!%p155_p0), [#allocation4], %s160_s24  ;;  %s164_s27 = scalar_lea.vmem (!%p155_p0), [#allocation3], %s301_s25 }
  0x30   : > { %402 = dma.done.wait (%p558_p7), %s161_s26, 256  }
  0x31   : > { %404 = vsyncadd (%p558_p7), %s161_s26, 4294967040  ;;  %v194_v0 = vld [vmem:[%s164_s27] sm:$0xff]  ;;  %v195_v2 = vld [vmem:[%s164_s27 + $0x8] sm:$0xff]  ;;  %s209_s28 = sld [smem:[#allocation2]]  ;;  %s302_s22 = sshll.u32 %s293_s2, 1  ;;  %vm223_vm0 = vcmask 7168  }
  0x32   : > { %v304_v1 = vld [vmem:[%s551_s1] ss:$0 sm:$0xff]  ;;  %p189_p8 = scmp.lt.s32.totalorder %s302_s22, 7 }
  0x33   : > { %v203_v3 = vmul.f32 %v304_v1, %v194_v0  ;;  %v204_v4 = vmul.f32 %v304_v1, %v195_v2 }
  0x34   : > { %s564_s22 = smov (!%p189_p8, %s302_s22), 7 }
  0x35   : > { %205 = vadd.xlane.f32.xlu0 %v203_v3  ;;  %s303_s30 = sshll.u32 %s564_s22, 3 }
  0x36   : > { %s192_s7 = scalar_lea.vmem %s553_s3, %s303_s30 }
  0x37   : > { %v210_v5 = vstv %s209_s28 }
  0x39   : > { %207 = vadd.xlane.f32.xlu0 %v204_v4 }
  0xbe   : > { %v206_v6 = vpop.xlane.xlu0 %205 }
  0xbf   : > { %v211_v7 = vadd.f32 %v210_v5, %v206_v6 }
  0xc1   : > { %v213_v8 = vsub.f32 0.0, %v211_v7 }
  0xc2   : > { %v208_v9 = vpop.xlane.xlu0 %207 }
  0xc3   : > { %v215_v10 = vmul.f32 1.442695, %v213_v8  ;;  %v212_v11 = vadd.f32 %v210_v5, %v208_v9 }
  0xc5   : > { %349 = vpow2.f32 %v215_v10  ;;  %v214_v12 = vsub.f32 0.0, %v212_v11 }
  0xc7   : > { %v217_v13 = vmul.f32 1.442695, %v214_v12 }
  0xc9   : > { %351 = vpow2.f32 %v217_v13 }
  0xd2   : > { %v350_v14 = vpop.eup %349 }
  0xd3   : > { %v219_v15 = vadd.f32 1.0, %v350_v14 }
  0xd5   : > { %353 = vrcp.f32 %v219_v15 }
  0xd6   : > { %v352_v16 = vpop.eup %351 }
  0xd7   : > { %v220_v17 = vadd.f32 1.0, %v352_v16 }
  0xd9   : > { %355 = vrcp.f32 %v220_v17 }
  0xe2   : > { %v354_v18 = vpop.eup %353 }
  0xe3   : > { %224 = vst.msk [vmem:[%s192_s7] sm:$0xff] %vm223_vm0, %v354_v18 }
  0xe6   : > { %v356_v19 = vpop.eup %355 }
  0xe7   : > { %225 = vst.msk [vmem:[%s192_s7 + $0x8] sm:$0xff] %vm223_vm0, %v356_v19 }
  0xe8 PF: > { %p14_p9 = scmp.ge.s32.totalorder %s467_s18, 6   ;;  %s559_s14 = smov %s411_s15 }
  0xe9   : > { %s560_s15 = smov %s415_s16  ;;  %s561_s16 = smov %s477_s21 }
  0xea   : > { %s562_s17 = smov %s467_s18  ;;  %16 = sbr.rel (!%p14_p9) target bundleno = 5 (0x5), region = 72 }
  0xef   :  { %248 = vsyncpa [#allocation4], 1 }
  0xf0   :  { %250 = vsyncpa [#allocation4 + $0x1], 1 }

</bundles_post_ra>
